<compile_context>
chip_gen: v6e
topology: v6e:2x2x1
jax: 0.10.0
libtpu: 0.0.40
codegen_flags: <defaults>
</compile_context>

<pallas_src>
import jax
import jax.numpy as jnp
from jax.experimental import pallas as pl
from jax.experimental.pallas import tpu as pltpu

_LANES = 128


def _round_up(n: int, m: int) -> int:
    return ((n + m - 1) // m) * m


def _prob_diff_tanh_kernel(x_ref, dw_ref, db_ref, o_ref):
    # z[:, j] = x @ (w[:,1] - w[:,0])  -- identical for every lane j, since dw is
    # lane-replicated; this keeps the MXU output tile and the store 128-lane dense.
    z = jnp.dot(x_ref[...], dw_ref[...], preferred_element_type=jnp.float32)
    db = db_ref[0, 0]  # scalar read from SMEM
    # softmax(2-class) probability difference == tanh(logit_delta / 2)  (EUP op).
    o_ref[...] = jnp.tanh((z + db) * 0.5).astype(o_ref.dtype)


def _prob_diff_softmax_kernel(x_ref, w_ref, b_ref, o_ref):
    # Fallback for C > 2: lane-padded softmax; padded classes carry a -1e30 bias so
    # exp(.) underflows to 0 and they do not perturb the denominator.  The result is
    # broadcast across 128 lanes so the store stays unmasked; wrapper slices col 0.
    logits = jnp.dot(x_ref[...], w_ref[...],
                     preferred_element_type=jnp.float32) + b_ref[...]
    m = jnp.max(logits, axis=-1, keepdims=True)
    e = jnp.exp(logits - m)
    inv = pl.reciprocal(jnp.sum(e, axis=-1, keepdims=True), approx=True)
    diff = (e[:, 1:2] - e[:, 0:1]) * inv
    o_ref[...] = jnp.broadcast_to(diff, o_ref.shape).astype(o_ref.dtype)


def prob_difference(x, w, b, *, tb=None, vmem_budget_bytes=6 * 1024 * 1024):
    """x: [B, H], w: [H, C], b: [1, C] -> [B, 1] of p(class 1) - p(class 0)."""
    B, H = x.shape
    Hw, C = w.shape
    assert H == Hw and b.shape == (1, C)
    assert C >= 2, "ProbDifference needs at least 2 classes"

    # Keep elementwise math in f32 (v5e has no bf16 VPU/EUP).
    x = x.astype(jnp.float32)

    # --- batch tiling: largest row tile whose double-buffered x slab fits budget ---
    if tb is None:
        tb = max(8, min(1024, (vmem_budget_bytes // (H * 4)) // 8 * 8))
    tb = max(8, _round_up(tb, 8))
    tb = min(tb, _round_up(B, 8))
    Bp = _round_up(B, tb)
    if Bp != B:
        # Rows are independent (no cross-row reduction), so zero padding is inert.
        x = jnp.pad(x, ((0, Bp - B), (0, 0)))
    grid = (Bp // tb,)

    if C == 2:
        dw = (w[:, 1] - w[:, 0]).astype(jnp.float32)            # [H]
        w_in = jnp.broadcast_to(dw[:, None], (H, _LANES))       # lane-replicated
        b_in = jnp.reshape((b[0, 1] - b[0, 0]).astype(jnp.float32), (1, 1))
        kernel = _prob_diff_tanh_kernel
        Cp = _LANES
        b_spec = pl.BlockSpec(memory_space=pltpu.MemorySpace.SMEM)
        transcendentals = Bp * _LANES
    else:
        Cp = _round_up(C, _LANES)
        w_in = jnp.zeros((H, Cp), jnp.float32).at[:, :C].set(w.astype(jnp.float32))
        b_in = jnp.full((1, Cp), -1e30, jnp.float32).at[:, :C].set(
            b.astype(jnp.float32))
        kernel = _prob_diff_softmax_kernel
        b_spec = pl.BlockSpec((1, Cp), lambda i: (0, 0))
        transcendentals = Bp * Cp

    out = pl.pallas_call(
        kernel,
        out_shape=jax.ShapeDtypeStruct((Bp, _LANES), jnp.float32),
        grid_spec=pl.GridSpec(
            grid=grid,
            in_specs=[
                pl.BlockSpec((tb, H), lambda i: (i, 0)),      # x: streamed per tile
                pl.BlockSpec((H, Cp), lambda i: (0, 0)),      # weights: VMEM-resident
                b_spec,                                       # bias
            ],
            out_specs=pl.BlockSpec((tb, _LANES), lambda i: (i, 0)),  # lane-dense out
        ),
        compiler_params=pltpu.CompilerParams(
            dimension_semantics=("parallel",),  # batch tiles shard across TCs (v7x)
        ),
        cost_estimate=pl.CostEstimate(
            flops=2 * Bp * H * Cp,
            transcendentals=transcendentals,
            bytes_accessed=Bp * H * 4 + H * Cp * 4 + Cp * 4 + Bp * _LANES * 4,
        ),
    )(x, w_in, b_in)

    # Every lane holds the same value; slice column 0 -> [B, 1] (free layout plumbing).
    return out[:B, :1]


def prob_difference_ref(x, w, b):
    logits = x.astype(jnp.float32) @ w.astype(jnp.float32) + b.astype(jnp.float32)
    probs = jax.nn.softmax(logits, axis=-1)
    return (probs[:, 1:2] - probs[:, 0:1]).astype(jnp.float32)


if __name__ == "__main__":
    # Small, deterministic shapes: batch=8, hidden=32, classes=2.
    B, H, C = 8, 32, 2

    key = jax.random.PRNGKey(0)
    kx, kw, kb = jax.random.split(key, 3)

    x = jax.random.normal(kx, (B, H), dtype=jnp.float32)
    w = jax.random.normal(kw, (H, C), dtype=jnp.float32) * 0.1
    b = jax.random.normal(kb, (1, C), dtype=jnp.float32) * 0.1

    out = jax.block_until_ready(prob_difference(x, w, b))
    ref = prob_difference_ref(x, w, b)

    assert out.shape == (B, 1)
    assert jnp.allclose(out, ref, atol=1e-4, rtol=1e-4), (out, ref)

    print("KERNEL_OK")
</pallas_src>

<mosaic_0001>
module attributes {stable_mosaic.version = 11 : i64} {
  func.func @_prob_diff_tanh_kernel(%arg0: i32, %arg1: memref<8x32xf32, #tpu.memory_space<vmem>>, %arg2: memref<32x128xf32, #tpu.memory_space<vmem>>, %arg3: memref<1x1xf32, #tpu.memory_space<smem>>, %arg4: memref<8x128xf32, #tpu.memory_space<vmem>>) attributes {dimension_semantics = [#tpu.dimension_semantics<parallel>], iteration_bounds = array<i64: 1>, scalar_prefetch = 0 : i64, scratch_operands = 0 : i64, tpu.core_type = #tpu.core_type<tc>, window_params = [{transform_indices = @transform_0, window_bounds = array<i64: 8, 32>}, {pipeline_mode = #tpu.pipeline_mode<synchronous>, transform_indices = @transform_1, window_bounds = array<i64: 32, 128>}, {transform_indices = @transform_2, window_bounds = array<i64: 1, 1>}, {transform_indices = @transform_3, window_bounds = array<i64: 8, 128>}]} {
    %c0 = arith.constant 0 : index
    %c0_0 = arith.constant 0 : index
    %0 = vector.load %arg1[%c0, %c0_0] : memref<8x32xf32, #tpu.memory_space<vmem>>, vector<8x32xf32>
    %c0_1 = arith.constant 0 : index
    %c0_2 = arith.constant 0 : index
    %1 = vector.load %arg2[%c0_1, %c0_2] : memref<32x128xf32, #tpu.memory_space<vmem>>, vector<32x128xf32>
    %cst = arith.constant dense<0.000000e+00> : vector<8x128xf32>
    %2 = tpu.matmul %0, %1, %cst {dimension_numbers = #tpu.dot_dimension_numbers<[1], [0], [0], [1], [0, 0, 1, 1], [], []>} : vector<8x32xf32>, vector<32x128xf32>, vector<8x128xf32> -> vector<8x128xf32>
    %c0_3 = arith.constant 0 : index
    %c0_4 = arith.constant 0 : index
    %3 = memref.load %arg3[%c0_3, %c0_4] : memref<1x1xf32, #tpu.memory_space<smem>>
    %4 = vector.broadcast %3 : f32 to vector<8x128xf32>
    %5 = arith.addf %2, %4 : vector<8x128xf32>
    %cst_5 = arith.constant 5.000000e-01 : f32
    %6 = vector.broadcast %cst_5 : f32 to vector<8x128xf32>
    %7 = arith.mulf %5, %6 : vector<8x128xf32>
    %8 = math.tanh %7 : vector<8x128xf32>
    %c0_6 = arith.constant 0 : index
    %c0_7 = arith.constant 0 : index
    %9 = vector.load %arg4[%c0_6, %c0_7] : memref<8x128xf32, #tpu.memory_space<vmem>>, vector<8x128xf32>
    tpu.vector_store %arg4[%c0_6, %c0_7], %8 {strides = array<i32>} : memref<8x128xf32, #tpu.memory_space<vmem>>, vector<8x128xf32>,
    return
  }
  func.func @transform_0(%arg0: i32) -> (i32, i32) {
    %c0_i32 = arith.constant 0 : i32
    %c0_i32_0 = arith.constant 0 : i32
    return %arg0, %c0_i32 : i32, i32
  }
  func.func @transform_1(%arg0: i32) -> (i32, i32) {
    %c0_i32 = arith.constant 0 : i32
    %c0_i32_0 = arith.constant 0 : i32
    %c0_i32_1 = arith.constant 0 : i32
    return %c0_i32, %c0_i32_0 : i32, i32
  }
  func.func @transform_2(%arg0: i32) -> (i32, i32) {
    %c0_i32 = arith.constant 0 : i32
    %c0_i32_0 = arith.constant 0 : i32
    %c0_i32_1 = arith.constant 0 : i32
    return %c0_i32, %c0_i32_0 : i32, i32
  }
  func.func @transform_3(%arg0: i32) -> (i32, i32) {
    %c0_i32 = arith.constant 0 : i32
    %c0_i32_0 = arith.constant 0 : i32
    return %arg0, %c0_i32 : i32, i32
  }
}

</mosaic_0001>

<bundles_post_ra>
// kernel: tpu_custom_call.1
= control target key start
LH: loop header
LB: loop body
LE: loop exit
PB: predicated region body
PF: predicated region fallthrough
CT: control target
= control target key end

     0   :  { %9 = vsyncpa [#allocation4], 0  ;;  %s273_s0 = inlined_call_operand.hbm [shape: f32[8,32], index: 0, kind: input, shape index: {}]   ;;  %s274_s1 = inlined_call_operand.hbm [shape: f32[32,128], index: 1, kind: input, shape index: {}]   ;;  %s275_s2 = inlined_call_operand.<no memory space> [shape: f32[1,1], index: 2, kind: input, shape index: {}]   ;;  %s276_s3 = inlined_call_operand.hbm [shape: f32[8,128], index: 3, kind: output, shape index: {}]  }
   0x1   :  { %10 = vsyncpa [#allocation7], 0 }
   0x2   :  { %11 = vsyncpa [#allocation5], 0  ;;  %s234_s12 = smov [#allocation3]   ;;  %s235_s14 = smov [#allocation6]  }
   0x3   :  { %s18_s13 = sshll.u32 %s234_s12, 4  ;;  %s27_s15 = sshll.u32 %s235_s14, 4  ;;  %s19_s13 = int_to_ptr.vmem [resolvable:$true] %s18_s13  ;;  %s28_s15 = int_to_ptr.vmem [resolvable:$true] %s27_s15 }
   0x4   :  { %s176_s16 = scalar_lea.vmem %s19_s13, 128  ;;  %p181_p1 = scmp.lt.s32.totalorder %s19_s13, %s19_s13 }
   0x5   :  { %p177_p0 = scmp.ne.s32.totalorder %s19_s13, %s176_s16  ;;  %p182_p2 = scmp.lt.s32.totalorder %s176_s16, %s176_s16 }
   0x7   :  { %p183_p3 = por %p182_p2, %p181_p1 }
   0x9   :  { %p184_p4 = pnand %p183_p3, %p177_p0 }
   0xb   :  { %187 = shalt.err (!%p184_p4)
}
   0xc   :  { %21 = dma.hbm_to_vmem [thread:$0]  %s273_s0, 128, %s19_s13, [#allocation4]  }
   0xd   :  { %s196_s19 = scalar_lea.vmem %s28_s15, 512  ;;  %p201_p6 = scmp.lt.s32.totalorder %s28_s15, %s28_s15 }
   0xe   :  { %p197_p5 = scmp.ne.s32.totalorder %s28_s15, %s196_s19  ;;  %p202_p7 = scmp.lt.s32.totalorder %s196_s19, %s196_s19 }
  0x10   :  { %p203_p8 = por %p202_p7, %p201_p6 }
  0x12   :  { %p204_p9 = pnand %p203_p8, %p197_p5 }
  0x14   :  { %207 = shalt.err (!%p204_p9)
}
  0x15   :  { %s236_s20 = smov 128   ;;  %s237_s21 = smov 8  }
  0x16   :  { %33 = dma.hbm_to_vmem [thread:$0]  %s274_s1, 512, %s28_s15, [#allocation7], %s236_s20, %s236_s20, %s237_s21  }
  0x17   :  { %228 = dma.done.wait [#allocation4], 128  }
  0x18   :  { %229 = vsyncadd [#allocation4], 4294967168 }
  0x19   :  { %230 = dma.done.wait [#allocation7], 512  }
  0x1a   :  { %231 = vsyncadd [#allocation7], 4294966784  ;;  %v238_v0 = vmov 0.0   ;;  %vm239_vm0 = vmmov 0   ;;  %v46_v1 = vld [vmem:[#allocation6 + $0x18] sm:$0xff]  ;;  %v45_v2 = vld [vmem:[#allocation6 + $0x10] sm:$0xff]  ;;  %v48_v6 = vstv %s275_s2 }
  0x1b   :  { %148 = vmatprep.subr.mxu0 %v238_v0  ;;  %156 = vmatprep.mubr.msk.f32.mxu0 %vm239_vm0, %v238_v0  ;;  %v44_v3 = vld [vmem:[#allocation6 + $0x8] sm:$0xff]  ;;  %v43_v4 = vld [vmem:[#allocation6] sm:$0xff]  ;;  %v42_v5 = vld [vmem:[#allocation3] sm:$0xff]  ;;  %vm49_vm1 = vcmask 261120   ;;  %s240_s24 = smov [#allocation8]  }
  0x1c   :  { %149 = vmatpush3.msra.mxu0 %v46_v1  ;;  %s132_s25 = sshll.u32 %s240_s24, 4  ;;  %s133_s25 = int_to_ptr.vmem [resolvable:$true] %s132_s25 }
  0x1d   :  { %150 = vmatprep.subr.mxu0 %v238_v0  ;;  %s208_s26 = scalar_lea.vmem %s133_s25, 128  ;;  %p213_p11 = scmp.lt.s32.totalorder %s133_s25, %s133_s25 }
  0x1e   :  { %151 = vmatpush3.msra.mxu0 %v45_v2  ;;  %p209_p10 = scmp.ne.s32.totalorder %s133_s25, %s208_s26  ;;  %p214_p12 = scmp.lt.s32.totalorder %s208_s26, %s208_s26 }
  0x1f   :  { %152 = vmatprep.subr.mxu0 %v238_v0 }
  0x20   :  { %153 = vmatpush3.msra.mxu0 %v44_v3  ;;  %p215_p13 = por %p214_p12, %p213_p11 }
  0x21   :  { %154 = vmatprep.subr.mxu0 %v238_v0 }
  0x22   :  { %155 = vmatpush3.msra.mxu0 %v43_v4  ;;  %p216_p0 = pnand %p215_p13, %p209_p10 }
  0x23   :  { %157 = vmatmul.mubr.msk.f32.vlgmr.msra.gmra.mxu0 %vm49_vm1, %v42_v5 }
  0xe3   :  { %v119_v7 = vpop.f32.mrf.mxu0 }
  0xe4   :  { %v120_v8 = vadd.f32 %v119_v7, %v48_v6 }
  0xe5   :  { %v158_v9 = vpop.f32.mrf.mxu0 }
  0xe6   :  { %v123_v10 = vmul.f32 0.5, %v120_v8 }
  0xe8   :  { %166 = vtanh.f32 %v123_v10 }
  0xf5   :  { %v167_v11 = vpop.eup %166 }
  0xf6   :  { %125 = vst [vmem:[#allocation8] sm:$0xff] %v167_v11 }
  0xf7   :  { %219 = shalt.err (!%p216_p0)
}
  0xf8   :  { %135 = dma.vmem_to_hbm [thread:$0]  %s133_s25, 128, %s276_s3, [#allocation5]  }
  0xf9   :  { %232 = dma.done.wait [#allocation5], 128  }
  0xfa   :  { %233 = vsyncadd [#allocation5], 4294967168 }
  0xfb   :  { %139 = vsyncpa [#allocation4], 1 }
  0xfc   :  { %140 = vsyncpa [#allocation7], 1 }
  0xfd   :  { %141 = vsyncpa [#allocation5], 1 }

</bundles_post_ra>
